<compile_context>
chip_gen: v7x
topology: tpu7x:2x2x1
jax: 0.10.0
libtpu: 0.0.40
codegen_flags: <defaults>
</compile_context>

<pallas_src>
import jax
import jax.numpy as jnp
from jax.experimental import pallas as pl
from jax.experimental.pallas import tpu as pltpu


# ---------------------------------------------------------------------------
# Kernel
# ---------------------------------------------------------------------------
def _tree_lstm_kernel(x_ref, cc_ref, w_ref, out_ref):
    """x_ref : (M, 2H)  = [h0 | h1]
       cc_ref: (M, 2H)  = [c0 | c1]
       w_ref : (2H, 5H) fused weight, gate columns [i | o | f0 | f1 | u]
       out_ref: (M, 2H) = [c | h]
    """
    H = cc_ref.shape[-1] // 2

    # Single MXU matmul for all gates of both children.
    g = jnp.dot(x_ref[...], w_ref[...],
                preferred_element_type=jnp.float32)          # (M, 5H)

    # One sigmoid over the contiguous [i|o|f0|f1] slab, one tanh for u.
    sg = jax.nn.sigmoid(g[:, :4 * H])                        # (M, 4H)
    u = jnp.tanh(g[:, 4 * H:])                               # (M, H)

    i = sg[:, 0:H]
    o = sg[:, H:2 * H]
    f0 = sg[:, 2 * H:3 * H]
    f1 = sg[:, 3 * H:4 * H]

    c0 = cc_ref[:, 0:H]
    c1 = cc_ref[:, H:2 * H]

    # cat+sum over children == f0*c0 + f1*c1
    c = i * u + f0 * c0 + f1 * c1
    h = o * jnp.tanh(c)

    # Fused lane-dense output slab [c | h]: one full-tile store.
    out_ref[...] = jnp.concatenate([c, h], axis=-1).astype(out_ref.dtype)


# ---------------------------------------------------------------------------
# Weight preparation (call ONCE; weights are constant across all tree nodes)
# ---------------------------------------------------------------------------
def make_fused_weight(w_iou0, w_iou1, w_f0, w_f1):
    """Build the (2H, 5H) fused weight with gate columns [i | o | f0 | f1 | u].

    w_iou0, w_iou1 : (3H, H)  (nn.Linear(H, 3H, bias=False).weight)
    w_f0,  w_f1    : (H, H)   (nn.Linear(H, H,  bias=False).weight)
    """
    H = w_f0.shape[0]
    wi0, wo0, wu0 = jnp.split(w_iou0, 3, axis=0)   # each (H, H)
    wi1, wo1, wu1 = jnp.split(w_iou1, 3, axis=0)
    zeros = jnp.zeros((H, H), w_f0.dtype)
    # Row block 0 multiplies h0, row block 1 multiplies h1 (X = [h0 | h1]).
    top = jnp.concatenate([wi0.T, wo0.T, w_f0.T, zeros, wu0.T], axis=1)  # (H, 5H)
    bot = jnp.concatenate([wi1.T, wo1.T, zeros, w_f1.T, wu1.T], axis=1)  # (H, 5H)
    return jnp.concatenate([top, bot], axis=0)                           # (2H, 5H)


# ---------------------------------------------------------------------------
# Pallas wrappers
# ---------------------------------------------------------------------------
def _fused_node_step(x, cc, w_fused, *, row_block=128):
    """x, cc: (rows, 2H); w_fused: (2H, 5H).  Returns (rows, 2H) = [c | h]."""
    rows, two_h = x.shape
    five_h = w_fused.shape[1]

    # Row blocks must be multiples of 8 (sublane) and divide rows; otherwise
    # fall back to a single full block.
    if rows % row_block != 0 or row_block % 8 != 0:
        row_block = rows
    grid = (rows // row_block,)

    act_spec = pl.BlockSpec((row_block, two_h), lambda n: (n, 0))
    out_spec = pl.BlockSpec((row_block, two_h), lambda n: (n, 0))
    # Constant block index -> fused weight stays VMEM-resident across the grid.
    w_spec = pl.BlockSpec((two_h, five_h), lambda n: (0, 0))

    return pl.pallas_call(
        _tree_lstm_kernel,
        out_shape=jax.ShapeDtypeStruct((rows, two_h), x.dtype),
        grid=grid,
        in_specs=[act_spec, act_spec, w_spec],
        out_specs=out_spec,
        compiler_params=pltpu.CompilerParams(
            dimension_semantics=("parallel",)),
    )(x, cc, w_fused)


def binary_tree_lstm_forward_nodes(child_c, child_h, w_fused, *, row_block=128):
    """Node-batched forward.

    child_c, child_h : (2, R, H) — R rows of (possibly many tree nodes x batch).
    w_fused          : (2H, 5H) from make_fused_weight (built once).
    Returns (c, h), each (R, H).
    """
    H = child_c.shape[-1]
    x = jnp.concatenate([child_h[0], child_h[1]], axis=-1)    # (R, 2H)
    cc = jnp.concatenate([child_c[0], child_c[1]], axis=-1)   # (R, 2H)
    out = _fused_node_step(x, cc, w_fused, row_block=row_block)
    return out[:, :H], out[:, H:]


def binary_tree_lstm_forward(child_c, child_h, w_fused):
    """Module-identical call: child_c/child_h (2, 1, B, H) -> (c, h) each (1, B, H)."""
    _, _, B, H = child_h.shape
    c, h = binary_tree_lstm_forward_nodes(child_c.reshape(2, B, H),
                                          child_h.reshape(2, B, H),
                                          w_fused)
    return c[None, :, :], h[None, :, :]


# ---------------------------------------------------------------------------
# Plain-JAX reference (transliteration of the PyTorch forward) for verification
# ---------------------------------------------------------------------------
def _reference_forward(child_c, child_h, w_iou0, w_iou1, w_f0, w_f1):
    h0, h1 = child_h[0], child_h[1]
    H = h0.shape[-1]
    iou = h0 @ w_iou0.T + h1 @ w_iou1.T
    i = jax.nn.sigmoid(iou[..., 0:H])
    o = jax.nn.sigmoid(iou[..., H:2 * H])
    u = jnp.tanh(iou[..., 2 * H:3 * H])
    f0 = jax.nn.sigmoid(h0 @ w_f0.T)
    f1 = jax.nn.sigmoid(h1 @ w_f1.T)
    fc = f0 * child_c[0] + f1 * child_c[1]       # == cat+sum over children
    c = i * u + fc
    h = o * jnp.tanh(c)
    return c, h


# TODO(synk): Tree / TreeLSTMBase.extract_tree is host-side Python tree parsing
# (data-dependent pointer chasing); it stays on the host and is not a kernel.

if __name__ == "__main__":
    H = 32        # hidden_size
    B = 8         # batch
    N_NODES = 32  # number of tree nodes evaluated together in the batched path

    key = jax.random.PRNGKey(0)
    k_c, k_h, k0, k1, k2, k3, k_cb, k_hb = jax.random.split(key, 8)

    # Deterministic "Linear" weights, PyTorch-style uniform(-1/sqrt(H), 1/sqrt(H)).
    bound = 1.0 / jnp.sqrt(jnp.float32(H))
    w_iou0 = jax.random.uniform(k0, (3 * H, H), jnp.float32, -bound, bound)
    w_iou1 = jax.random.uniform(k1, (3 * H, H), jnp.float32, -bound, bound)
    w_f0 = jax.random.uniform(k2, (H, H), jnp.float32, -bound, bound)
    w_f1 = jax.random.uniform(k3, (H, H), jnp.float32, -bound, bound)

    # Fused weight is built ONCE (hoisted out of the per-node call path).
    w_fused = jax.block_until_ready(make_fused_weight(w_iou0, w_iou1, w_f0, w_f1))

    # ---- Single-node call (module-identical shapes) ----
    child_c = jax.random.normal(k_c, (2, 1, B, H), jnp.float32)
    child_h = jax.random.normal(k_h, (2, 1, B, H), jnp.float32)

    c, h = binary_tree_lstm_forward(child_c, child_h, w_fused)
    jax.block_until_ready((c, h))

    c_ref, h_ref = _reference_forward(child_c, child_h,
                                      w_iou0, w_iou1, w_f0, w_f1)
    assert c.shape == (1, B, H) and h.shape == (1, B, H)
    assert jnp.allclose(c, c_ref, atol=1e-4, rtol=1e-4)
    assert jnp.allclose(h, h_ref, atol=1e-4, rtol=1e-4)

    # ---- Node-batched path: many tree nodes in one pallas_call ----
    R = N_NODES * B                                   # 256 rows
    child_c_b = jax.random.normal(k_cb, (2, R, H), jnp.float32)
    child_h_b = jax.random.normal(k_hb, (2, R, H), jnp.float32)

    c_b, h_b = binary_tree_lstm_forward_nodes(child_c_b, child_h_b, w_fused,
                                              row_block=128)   # grid=(2,)
    jax.block_until_ready((c_b, h_b))

    c_bref, h_bref = _reference_forward(child_c_b, child_h_b,
                                        w_iou0, w_iou1, w_f0, w_f1)
    assert c_b.shape == (R, H) and h_b.shape == (R, H)
    assert jnp.allclose(c_b, c_bref, atol=1e-4, rtol=1e-4)
    assert jnp.allclose(h_b, h_bref, atol=1e-4, rtol=1e-4)

    print("KERNEL_OK")
</pallas_src>

<mosaic_0001>
module attributes {stable_mosaic.version = 11 : i64} {
  func.func @_tree_lstm_kernel(%arg0: i32, %arg1: memref<8x64xf32, #tpu.memory_space<vmem>>, %arg2: memref<8x64xf32, #tpu.memory_space<vmem>>, %arg3: memref<64x160xf32, #tpu.memory_space<vmem>>, %arg4: memref<8x64xf32, #tpu.memory_space<vmem>>) attributes {dimension_semantics = [#tpu.dimension_semantics<parallel>], iteration_bounds = array<i64: 1>, scalar_prefetch = 0 : i64, scratch_operands = 0 : i64, tpu.core_type = #tpu.core_type<tc>, window_params = [{transform_indices = @transform_0, window_bounds = array<i64: 8, 64>}, {transform_indices = @transform_1, window_bounds = array<i64: 8, 64>}, {pipeline_mode = #tpu.pipeline_mode<synchronous>, transform_indices = @transform_2, window_bounds = array<i64: 64, 160>}, {transform_indices = @transform_3, window_bounds = array<i64: 8, 64>}]} {
    %c0 = arith.constant 0 : index
    %c0_0 = arith.constant 0 : index
    %0 = vector.load %arg1[%c0, %c0_0] : memref<8x64xf32, #tpu.memory_space<vmem>>, vector<8x64xf32>
    %c0_1 = arith.constant 0 : index
    %c0_2 = arith.constant 0 : index
    %1 = vector.load %arg3[%c0_1, %c0_2] : memref<64x160xf32, #tpu.memory_space<vmem>>, vector<64x160xf32>
    %cst = arith.constant dense<0.000000e+00> : vector<8x160xf32>
    %2 = tpu.matmul %0, %1, %cst {dimension_numbers = #tpu.dot_dimension_numbers<[1], [0], [0], [1], [0, 0, 1, 1], [], []>} : vector<8x64xf32>, vector<64x160xf32>, vector<8x160xf32> -> vector<8x160xf32>
    %3 = vector.extract_strided_slice %2 {offsets = [0, 0], sizes = [8, 128], strides = [1, 1]} : vector<8x160xf32> to vector<8x128xf32>
    %4 = arith.negf %3 : vector<8x128xf32>
    %5 = math.exp %4 : vector<8x128xf32>
    %cst_3 = arith.constant 1.000000e+00 : f32
    %6 = vector.broadcast %cst_3 : f32 to vector<8x128xf32>
    %7 = arith.addf %6, %5 : vector<8x128xf32>
    %8 = arith.divf %6, %7 : vector<8x128xf32>
    %9 = vector.extract_strided_slice %2 {offsets = [0, 128], sizes = [8, 32], strides = [1, 1]} : vector<8x160xf32> to vector<8x32xf32>
    %10 = math.tanh %9 : vector<8x32xf32>
    %11 = vector.extract_strided_slice %8 {offsets = [0, 0], sizes = [8, 32], strides = [1, 1]} : vector<8x128xf32> to vector<8x32xf32>
    %12 = vector.extract_strided_slice %8 {offsets = [0, 32], sizes = [8, 32], strides = [1, 1]} : vector<8x128xf32> to vector<8x32xf32>
    %13 = vector.extract_strided_slice %8 {offsets = [0, 64], sizes = [8, 32], strides = [1, 1]} : vector<8x128xf32> to vector<8x32xf32>
    %14 = vector.extract_strided_slice %8 {offsets = [0, 96], sizes = [8, 32], strides = [1, 1]} : vector<8x128xf32> to vector<8x32xf32>
    %c0_4 = arith.constant 0 : index
    %c0_5 = arith.constant 0 : index
    %15 = vector.load %arg2[%c0_4, %c0_5] : memref<8x64xf32, #tpu.memory_space<vmem>>, vector<8x32xf32>
    %c0_6 = arith.constant 0 : index
    %c32 = arith.constant 32 : index
    %16 = vector.load %arg2[%c0_6, %c32] : memref<8x64xf32, #tpu.memory_space<vmem>>, vector<8x32xf32>
    %17 = arith.mulf %11, %10 : vector<8x32xf32>
    %18 = arith.mulf %13, %15 : vector<8x32xf32>
    %19 = arith.addf %17, %18 : vector<8x32xf32>
    %20 = arith.mulf %14, %16 : vector<8x32xf32>
    %21 = arith.addf %19, %20 : vector<8x32xf32>
    %22 = math.tanh %21 : vector<8x32xf32>
    %23 = arith.mulf %12, %22 : vector<8x32xf32>
    %24 = tpu.concatenate %21, %23 in 1 : vector<8x32xf32>, vector<8x32xf32> -> vector<8x64xf32>
    %c0_7 = arith.constant 0 : index
    %c0_8 = arith.constant 0 : index
    %25 = vector.load %arg4[%c0_7, %c0_8] : memref<8x64xf32, #tpu.memory_space<vmem>>, vector<8x64xf32>
    tpu.vector_store %arg4[%c0_7, %c0_8], %24 {strides = array<i32>} : memref<8x64xf32, #tpu.memory_space<vmem>>, vector<8x64xf32>,
    return
  }
  func.func @transform_0(%arg0: i32) -> (i32, i32) {
    %c0_i32 = arith.constant 0 : i32
    %c0_i32_0 = arith.constant 0 : i32
    return %arg0, %c0_i32 : i32, i32
  }
  func.func @transform_1(%arg0: i32) -> (i32, i32) {
    %c0_i32 = arith.constant 0 : i32
    %c0_i32_0 = arith.constant 0 : i32
    return %arg0, %c0_i32 : i32, i32
  }
  func.func @transform_2(%arg0: i32) -> (i32, i32) {
    %c0_i32 = arith.constant 0 : i32
    %c0_i32_0 = arith.constant 0 : i32
    %c0_i32_1 = arith.constant 0 : i32
    return %c0_i32, %c0_i32_0 : i32, i32
  }
  func.func @transform_3(%arg0: i32) -> (i32, i32) {
    %c0_i32 = arith.constant 0 : i32
    %c0_i32_0 = arith.constant 0 : i32
    return %arg0, %c0_i32 : i32, i32
  }
}

</mosaic_0001>

<bundles_post_ra>
// kernel: tpu_custom_call.1
= control target key start
LH: loop header
LB: loop body
LE: loop exit
PB: predicated region body
PF: predicated region fallthrough
CT: control target
= control target key end

     0   :  { %8 = vsyncpa [#allocation3], 0  ;;  %s400_s0 = inlined_call_operand.hbm [shape: f32[8,64], index: 0, kind: input, shape index: {}]   ;;  %s401_s1 = inlined_call_operand.hbm [shape: f32[8,64], index: 1, kind: input, shape index: {}]   ;;  %s402_s2 = inlined_call_operand.hbm [shape: f32[64,160], index: 2, kind: input, shape index: {}]   ;;  %s403_s3 = inlined_call_operand.hbm [shape: f32[8,64], index: 3, kind: output, shape index: {}]  }
   0x1   :  { %9 = vsyncpa [#allocation6], 0 }
   0x2   :  { %10 = vsyncpa [#allocation4], 0  ;;  %s321_s12 = smov [#allocation5]   ;;  %s322_s14 = smov [#allocation2]  }
   0x3   :  { %s27_s13 = sshll.u32 %s321_s12, 4  ;;  %s17_s15 = sshll.u32 %s322_s14, 4  ;;  %s28_s13 = int_to_ptr.vmem [resolvable:$true] %s27_s13  ;;  %s18_s15 = int_to_ptr.vmem [resolvable:$true] %s17_s15 }
   0x4   :  { %s227_s18 = scalar_lea.hbm %s401_s1, 128 }
   0x5   :  { %p228_p0 = scmp.ne.s32.totalorder %s401_s1, %s227_s18  ;;  %p231_p1 = scmp.lt.u32.totalorder %s227_s18, %s401_s1 }
   0x7   :  { %p233_p2 = pnand %p231_p1, %p228_p0 }
   0x9   :  { %236 = shalt.err (!%p233_p2)
}
   0xa   :  { %s237_s23 = scalar_lea.vmem %s28_s13, 128  ;;  %p242_p4 = scmp.lt.s32.totalorder %s28_s13, %s28_s13 }
   0xb   :  { %p238_p3 = scmp.ne.s32.totalorder %s28_s13, %s237_s23  ;;  %p243_p5 = scmp.lt.s32.totalorder %s237_s23, %s237_s23 }
   0xd   :  { %p244_p6 = por %p243_p5, %p242_p4 }
   0xf   :  { %p245_p7 = pnand %p244_p6, %p238_p3 }
  0x11   :  { %248 = shalt.err (!%p245_p7)
}
  0x12   :  { %30 = dma.hbm_to_vmem [thread:$0]  %s401_s1, 128, %s28_s13, [#allocation6]  }
  0x13   :  { %s249_s28 = scalar_lea.hbm %s400_s0, 128 }
  0x14   :  { %p250_p8 = scmp.ne.s32.totalorder %s400_s0, %s249_s28  ;;  %p253_p9 = scmp.lt.u32.totalorder %s249_s28, %s400_s0 }
  0x16   :  { %p255_p10 = pnand %p253_p9, %p250_p8 }
  0x18   :  { %258 = shalt.err (!%p255_p10)
}
  0x19   :  { %s259_s6 = scalar_lea.vmem %s18_s15, 128  ;;  %p264_p12 = scmp.lt.s32.totalorder %s18_s15, %s18_s15 }
  0x1a   :  { %p260_p11 = scmp.ne.s32.totalorder %s18_s15, %s259_s6  ;;  %p265_p13 = scmp.lt.s32.totalorder %s259_s6, %s259_s6 }
  0x1c   :  { %p266_p0 = por %p265_p13, %p264_p12 }
  0x1e   :  { %p267_p1 = pnand %p266_p0, %p260_p11 }
  0x20   :  { %270 = shalt.err (!%p267_p1)
}
  0x21   :  { %20 = dma.hbm_to_vmem [thread:$0]  %s400_s0, 128, %s18_s15, [#allocation3]  }
  0x22   :  { %s323_s8 = smov [#allocation7]   ;;  %s271_s12 = scalar_lea.hbm %s402_s2, 2048 }
  0x23   :  { %s36_s9 = sshll.u32 %s323_s8, 4  ;;  %p272_p2 = scmp.ne.s32.totalorder %s402_s2, %s271_s12  ;;  %s37_s9 = int_to_ptr.vmem [resolvable:$true] %s36_s9 }
  0x24   :  { %p275_p3 = scmp.lt.u32.totalorder %s271_s12, %s402_s2 }
  0x26   :  { %p277_p4 = pnand %p275_p3, %p272_p2 }
  0x28   :  { %280 = shalt.err (!%p277_p4)
}
  0x29   :  { %s281_s18 = scalar_lea.vmem %s37_s9, 2048  ;;  %p286_p6 = scmp.lt.s32.totalorder %s37_s9, %s37_s9 }
  0x2a   :  { %p282_p5 = scmp.ne.s32.totalorder %s37_s9, %s281_s18  ;;  %p287_p7 = scmp.lt.s32.totalorder %s281_s18, %s281_s18 }
  0x2c   :  { %p288_p8 = por %p287_p7, %p286_p6 }
  0x2e   :  { %p289_p9 = pnand %p288_p8, %p282_p5 }
  0x30   :  { %292 = shalt.err (!%p289_p9)
}
  0x31   :  { %s324_s0 = smov 256   ;;  %s325_s15 = smov 16  }
  0x32   :  { %42 = dma.hbm_to_vmem [thread:$0]  %s402_s2, 2048, %s37_s9, [#allocation6], %s324_s0, %s324_s0, %s325_s15  }
  0x33   :  { %315 = dma.done.wait [#allocation3], 128  }
  0x34   :  { %316 = vsyncadd [#allocation3], 4294967168 }
  0x35   :  { %317 = dma.done.wait [#allocation6], 2176  }
  0x36   :  { %318 = vsyncadd [#allocation6], 4294965120  ;;  %v326_v0 = vmov 0.0   ;;  %v54_v1 = vld [vmem:[#allocation7 + $0x8] sm:$0xff]  ;;  %v56_v2 = vld [vmem:[#allocation7 + $0x18] sm:$0xff]  ;;  %s327_s2 = smov 64  }
  0x37   :  { %137 = vmatprep.mubr.f32.mxu0 %v326_v0  ;;  %v53_v3 = vld [vmem:[#allocation7] sm:$0xff]  ;;  %v194_v4 = vpack.c.bf16 %v56_v2, %v54_v1  ;;  %v55_v5 = vld [vmem:[#allocation7 + $0x10] sm:$0xff]  ;;  %v58_v6 = vld [vmem:[#allocation7 + $0x28] sm:$0xff]  ;;  %vm69_vm0 = vcmask 523264   ;;  %s328_s21 = smov 32   ;;  %s329_s22 = smov [#allocation8]  }
  0x38   :  { %v60_v7 = vld [vmem:[#allocation7 + $0x38] sm:$0xff]  ;;  %v196_v8 = vpack.c.bf16 %v55_v5, %v53_v3  ;;  %v57_v10 = vld [vmem:[#allocation7 + $0x20] sm:$0xff]  ;;  %v59_v11 = vld [vmem:[#allocation7 + $0x30] sm:$0xff]  ;;  %s182_s23 = sshll.u32 %s329_s22, 4  ;;  %vm173_vm1 = vcmask 261120   ;;  %s183_s23 = int_to_ptr.vmem [resolvable:$true] %s182_s23 }
  0x39   :  { %v198_v9 = vpack.c.bf16 %v60_v7, %v58_v6  ;;  %v62_v12 = vld [vmem:[#allocation7 + $0x48] sm:$0xff]  ;;  %195 = vmatprep.subr.bf16.mxu0 %v194_v4  ;;  %v64_v13 = vld [vmem:[#allocation7 + $0x58] sm:$0xff]  ;;  %v200_v14 = vpack.c.bf16 %v59_v11, %v57_v10  ;;  %v61_v16 = vld [vmem:[#allocation7 + $0x40] sm:$0xff]  ;;  %s293_s24 = scalar_lea.vmem %s183_s23, 128  ;;  %p298_p11 = scmp.lt.s32.totalorder %s183_s23, %s183_s23 }
  0x3a   :  { %197 = vmatpush1.bf16.msra.mxu0 %v196_v8  ;;  %v202_v15 = vpack.c.bf16 %v64_v13, %v62_v12  ;;  %v63_v17 = vld [vmem:[#allocation7 + $0x50] sm:$0xff]  ;;  %v151_v18 = vld [vmem:[#allocation5] sm:$0xff]  ;;  %v66_v19 = vld [vmem:[#allocation7 + $0x68] sm:$0xff]  ;;  %p294_p10 = scmp.ne.s32.totalorder %s183_s23, %s293_s24  ;;  %p299_p12 = scmp.lt.s32.totalorder %s293_s24, %s293_s24 }
  0x3b   :  { %199 = vmatprep.subr.bf16.mxu0 %v198_v9  ;;  %v68_v20 = vld [vmem:[#allocation7 + $0x78] sm:$0xff]  ;;  %154 = vrot.lane.b32.xlu0 %v151_v18, %s327_s2  ;;  %v204_v21 = vpack.c.bf16 %v63_v17, %v61_v16  ;;  %v65_v23 = vld [vmem:[#allocation7 + $0x60] sm:$0xff]  ;;  %v67_v24 = vld [vmem:[#allocation7 + $0x70] sm:$0xff] }
  0x3c   :  { %v206_v22 = vpack.c.bf16 %v68_v20, %v66_v19  ;;  %v208_v25 = vpack.c.bf16 %v67_v24, %v65_v23  ;;  %v52_v26 = vld [vmem:[#allocation2] sm:$0xff]  ;;  %p300_p13 = por %p299_p12, %p298_p11 }
  0x3e   :  { %201 = vmatpush1.bf16.msra.mxu0 %v200_v14  ;;  %p301_p0 = pnand %p300_p13, %p294_p10 }
  0x3f   :  { %203 = vmatprep.subr.bf16.mxu0 %v202_v15 }
  0x42   :  { %205 = vmatpush1.bf16.msra.mxu0 %v204_v21 }
  0x43   :  { %207 = vmatprep.subr.bf16.mxu0 %v206_v22 }
  0x46   :  { %209 = vmatpush1.bf16.msra.mxu0 %v208_v25 }
  0x49   :  { %192 = vmatmul.mubr.msk.f32.vlgmr.msra.gmra.mrb[0].mxu0 %vm69_vm0, %v52_v26 }
  0xad   :  { %v155_v32 = vpop.permute.xlu0 %154 }
 0x11c   :  { %v139_v27 = vpop.f32.mrb[0].mxu0 }
 0x11d   :  { %v193_v28 = vmul.f32 -1.442695, %v139_v27  ;;  %v141_v29 = vpop.f32.mrb[1].mxu0 }
 0x11f   :  { %219 = vpow2.f32 %v193_v28 }
 0x129   :  { %v220_v30 = vpop.eup %219 }
 0x12a   :  { %v147_v31 = vadd.f32 1.0, %v220_v30 }
 0x12c   :  { %221 = vrcp.f32 %v147_v31 }
 0x12d   :  { %223 = vtanh.f32 %v141_v29 }
 0x136   :  { %v222_v33 = vpop.eup %221 }
 0x137   :  { %v157_v34 = vmul.f32 %v222_v33, %v155_v32  ;;  %v224_v35 = vpop.eup %223 }
 0x138   :  { %v152_v36 = vmul.f32 %v224_v35, %v222_v33 }
 0x139   :  { %163 = vrot.lane.b32.xlu1 %v157_v34, %s328_s21  ;;  %159 = vrot.lane.b32.xlu0 %v157_v34, %s327_s2 }
 0x1ab   :  { %v160_v37 = vpop.permute.xlu0 %159  ;;  %v164_v39 = vpop.permute.xlu1 %163 }
 0x1ac   :  { %v162_v38 = vadd.f32 %v160_v37, %v152_v36 }
 0x1ae   :  { %v166_v40 = vadd.f32 %v164_v39, %v162_v38 }
 0x1b0   :  { %225 = vtanh.f32 %v166_v40 }
 0x1ba   :  { %v226_v41 = vpop.eup %225 }
 0x1bb   :  { %169 = vrot.lane.b32.xlu1 %v226_v41, %s328_s21 }
 0x22d   :  { %v170_v42 = vpop.permute.xlu1 %169 }
 0x22e   :  { %v172_v43 = vmul.f32 %v222_v33, %v170_v42 }
 0x230   :  { %v174_v44 = vsel %vm173_vm1, %v166_v40, %v172_v43 }
 0x231   :  { %175 = vst.msk [vmem:[#allocation8] sm:$0xff] %vm69_vm0, %v174_v44 }
 0x232   :  { %304 = shalt.err (!%p301_p0)
}
 0x233   :  { %s305_s27 = scalar_lea.hbm %s403_s3, 128 }
 0x234   :  { %p306_p1 = scmp.ne.s32.totalorder %s403_s3, %s305_s27  ;;  %p309_p2 = scmp.lt.u32.totalorder %s305_s27, %s403_s3 }
 0x236   :  { %p311_p3 = pnand %p309_p2, %p306_p1 }
 0x238   :  { %314 = shalt.err (!%p311_p3)
}
 0x239   :  { %185 = dma.vmem_to_hbm [thread:$0]  %s183_s23, 128, %s403_s3, [#allocation4]  }
 0x23a   :  { %319 = dma.done.wait [#allocation4], 128  }
 0x23b   :  { %320 = vsyncadd [#allocation4], 4294967168 }
 0x23c   :  { %189 = vsyncpa [#allocation3], 1 }
 0x23d   :  { %190 = vsyncpa [#allocation6], 1 }
 0x23e   :  { %191 = vsyncpa [#allocation4], 1 }

</bundles_post_ra>
